<compile_context>
chip_gen: v7x
topology: tpu7x:2x2x1
jax: 0.10.0
libtpu: 0.0.40
codegen_flags: <defaults>
</compile_context>

<pallas_src>
import functools

import jax
import jax.numpy as jnp
from jax.experimental import pallas as pl
from jax.experimental.pallas import tpu as pltpu


def _lane_dense_factor(f, max_cols=512):
    """Largest multiple-of-128 divisor of f (capped at max_cols); fallback f."""
    best = 0
    c = 128
    while c <= min(f, max_cols):
        if f % c == 0:
            best = c
        c += 128
    return best if best else f


# ----------------------------------------------------------------------------
# Kernel 1: fused MLP (LayerNorm -> fc1 -> GELU -> fc2 [+ residual]) -> LayerNorm
# Used standalone for PatchMLP; the same math is inlined as a prologue of the
# fuse kernel for ConceptMLP.
# ----------------------------------------------------------------------------
def _mlp_ln_kernel(x_ref, g1_ref, b1_ref, w1_ref, bb1_ref, w2_ref, bb2_ref,
                   g2_ref, b2_ref, o_ref, *, use_residual):
    x = x_ref[...].astype(jnp.float32)                       # (T, in_dim)

    # LayerNorm(in_dim), eps=1e-5 (PyTorch default) -- f32 math.
    mu = jnp.mean(x, axis=-1, keepdims=True)
    var = jnp.mean(jnp.square(x - mu), axis=-1, keepdims=True)
    h = (x - mu) * jax.lax.rsqrt(var + 1e-5)
    h = h * g1_ref[...] + b1_ref[...]

    # fc1: bf16 operands, f32 accumulation (MXU fast path), exact-erf GELU
    # (PyTorch nn.GELU default; kept exact for parity).
    h = jnp.dot(h.astype(jnp.bfloat16), w1_ref[...],
                preferred_element_type=jnp.float32) + bb1_ref[...]
    h = 0.5 * h * (1.0 + jax.lax.erf(h * 0.7071067811865476))

    # fc2 (+ residual)
    h = jnp.dot(h.astype(jnp.bfloat16), w2_ref[...],
                preferred_element_type=jnp.float32) + bb2_ref[...]
    if use_residual:
        # Re-read x from VMEM at the add site: keeps the f32 x tile out of the
        # vreg file across both matmuls (avoids spills around the MXU epilogue).
        h = h + x_ref[...].astype(jnp.float32)

    # final LayerNorm(out_dim)
    mu2 = jnp.mean(h, axis=-1, keepdims=True)
    var2 = jnp.mean(jnp.square(h - mu2), axis=-1, keepdims=True)
    y = (h - mu2) * jax.lax.rsqrt(var2 + 1e-5)
    y = y * g2_ref[...] + b2_ref[...]
    o_ref[...] = y.astype(o_ref.dtype)


def mlp_layernorm(x, params, *, use_residual, max_row_tile=256):
    """x: (N, in_dim) -> (N, out_dim). Rows tiled, weights resident in VMEM.

    Weights are expected pre-cast to bf16 (done once at init).  row_tile=256
    keeps the 256-wide MXU fed on v6e/v7x; vmem_limit_bytes=32MiB keeps real
    PatchMLP dims inside v5e's scoped VMEM too.
    """
    n, in_dim = x.shape
    hidden = params["w1"].shape[1]
    out_dim = params["w2"].shape[1]

    row_tile = n if n <= max_row_tile else max_row_tile
    grid = (pl.cdiv(n, row_tile),)

    kern = functools.partial(_mlp_ln_kernel, use_residual=use_residual)
    out = pl.pallas_call(
        kern,
        out_shape=jax.ShapeDtypeStruct((n, out_dim), x.dtype),
        grid=grid,
        in_specs=[
            pl.BlockSpec((row_tile, in_dim), lambda i: (i, 0)),   # x tile
            pl.BlockSpec((1, in_dim), lambda i: (0, 0)),          # ln1 gamma
            pl.BlockSpec((1, in_dim), lambda i: (0, 0)),          # ln1 beta
            pl.BlockSpec((in_dim, hidden), lambda i: (0, 0)),     # fc1 W (bf16)
            pl.BlockSpec((1, hidden), lambda i: (0, 0)),          # fc1 b
            pl.BlockSpec((hidden, out_dim), lambda i: (0, 0)),    # fc2 W (bf16)
            pl.BlockSpec((1, out_dim), lambda i: (0, 0)),         # fc2 b
            pl.BlockSpec((1, out_dim), lambda i: (0, 0)),         # ln2 gamma
            pl.BlockSpec((1, out_dim), lambda i: (0, 0)),         # ln2 beta
        ],
        out_specs=pl.BlockSpec((row_tile, out_dim), lambda i: (i, 0)),
        compiler_params=pltpu.CompilerParams(
            dimension_semantics=("parallel",),
            vmem_limit_bytes=32 * 1024 * 1024),
    )(x, params["ln1_g"], params["ln1_b"], params["w1"], params["b1"],
      params["w2"], params["b2"], params["ln2_g"], params["ln2_b"])
    return out


# ----------------------------------------------------------------------------
# Kernel 2: ConceptMLP + post_fuse fused into ONE launch.
#   Prologue: LN -> fc1 -> GELU -> fc2 -> +residual -> LN on the tiny (M, D)
#   raw object embeds (weights resident; recomputed per grid step -- trivially
#   small -- so it is correct under megacore "parallel" splitting).
#   Body: masked_scatter_ of the MLP'd object embeds into the text sequence
#   via an int32 one-hot gather matmul + select, tiled over text rows.
# ----------------------------------------------------------------------------
def _concept_fuse_kernel(excl_ref, text_ref, obj_ref,
                         g1_ref, b1_ref, w1_ref, bb1_ref, w2_ref, bb2_ref,
                         g2_ref, b2_ref, o_ref):
    # --- ConceptMLP prologue on the (M, D) raw object embeds ---
    xo = obj_ref[...].astype(jnp.float32)
    mu = jnp.mean(xo, axis=-1, keepdims=True)
    var = jnp.mean(jnp.square(xo - mu), axis=-1, keepdims=True)
    h = (xo - mu) * jax.lax.rsqrt(var + 1e-5)
    h = h * g1_ref[...] + b1_ref[...]
    h = jnp.dot(h.astype(jnp.bfloat16), w1_ref[...],
                preferred_element_type=jnp.float32) + bb1_ref[...]
    h = 0.5 * h * (1.0 + jax.lax.erf(h * 0.7071067811865476))   # exact GELU
    h = jnp.dot(h.astype(jnp.bfloat16), w2_ref[...],
                preferred_element_type=jnp.float32) + bb2_ref[...]
    h = h + xo                                                  # residual
    mu2 = jnp.mean(h, axis=-1, keepdims=True)
    var2 = jnp.mean(jnp.square(h - mu2), axis=-1, keepdims=True)
    obj = (h - mu2) * jax.lax.rsqrt(var2 + 1e-5) * g2_ref[...] + b2_ref[...]

    # --- masked_scatter_: obj row k goes to the k-th masked text position ---
    excl = excl_ref[...]                           # (T, 1) int32, -1 = unmasked
    text = text_ref[...].astype(jnp.float32)       # (T, D)
    t_rows, m = text.shape[0], obj.shape[0]
    onehot = (excl == jax.lax.broadcasted_iota(jnp.int32, (t_rows, m), 1)
              ).astype(jnp.float32)                # (T, M) int compare -> one-hot
    gathered = jnp.dot(onehot, obj, preferred_element_type=jnp.float32)
    fused = jnp.where(excl >= 0, gathered, text)
    # NOTE: PyTorch's masked_scatter_ is in-place, so `orignal_input_embeds`
    # aliases the scattered tensor and the alpha blend is a no-op for any
    # alpha; outputting the scattered tensor matches the reference exactly.
    o_ref[...] = fused.astype(o_ref.dtype)


def concept_post_fuse_pallas(text_embeds, object_embeds, image_token_mask,
                             concept_params, alpha=1.0, max_row_tile=1024):
    del alpha  # no-op under PyTorch's in-place masked_scatter_ (see kernel).
    b, s, d = text_embeds.shape
    n = b * s
    text = text_embeds.reshape(n, d)
    obj = object_embeds.reshape(-1, object_embeds.shape[-1])
    m = obj.shape[0]
    hidden = concept_params["w1"].shape[1]

    # Exclusive cumsum of the mask gives, for each masked position, which
    # flattened object row it consumes (masked_scatter_ ordering); -1 elsewhere.
    # NOTE: if the mask has more True positions than object rows, overflow
    # positions keep the original text embedding (masked_scatter_ would error).
    mask_flat = image_token_mask.reshape(n).astype(jnp.int32)
    excl = jnp.cumsum(mask_flat) - mask_flat
    excl = jnp.where(mask_flat > 0, excl, -1).astype(jnp.int32).reshape(n, 1)

    row_tile = n if n <= max_row_tile else max_row_tile
    cp = concept_params
    out = pl.pallas_call(
        _concept_fuse_kernel,
        out_shape=jax.ShapeDtypeStruct((n, d), text_embeds.dtype),
        grid=(pl.cdiv(n, row_tile),),
        in_specs=[
            pl.BlockSpec((row_tile, 1), lambda i: (i, 0)),    # scatter idx col
            pl.BlockSpec((row_tile, d), lambda i: (i, 0)),    # text tile
            pl.BlockSpec((m, d), lambda i: (0, 0)),           # raw object embeds
            pl.BlockSpec((1, d), lambda i: (0, 0)),           # ln1 gamma
            pl.BlockSpec((1, d), lambda i: (0, 0)),           # ln1 beta
            pl.BlockSpec((d, hidden), lambda i: (0, 0)),      # fc1 W (bf16)
            pl.BlockSpec((1, hidden), lambda i: (0, 0)),      # fc1 b
            pl.BlockSpec((hidden, d), lambda i: (0, 0)),      # fc2 W (bf16)
            pl.BlockSpec((1, d), lambda i: (0, 0)),           # fc2 b
            pl.BlockSpec((1, d), lambda i: (0, 0)),           # ln2 gamma
            pl.BlockSpec((1, d), lambda i: (0, 0)),           # ln2 beta
        ],
        out_specs=pl.BlockSpec((row_tile, d), lambda i: (i, 0)),
        compiler_params=pltpu.CompilerParams(
            dimension_semantics=("parallel",),
            vmem_limit_bytes=32 * 1024 * 1024),
    )(excl, text, obj, cp["ln1_g"], cp["ln1_b"], cp["w1"], cp["b1"],
      cp["w2"], cp["b2"], cp["ln2_g"], cp["ln2_b"])
    return out.reshape(b, s, d)


# ----------------------------------------------------------------------------
# Kernel 3: DDPM add_noise.  Lane-dense layout: per-sample features reshaped
# to (rows, cols) with cols a multiple of 128, grid over (batch, row tiles);
# per-sample coefficients live untiled in SMEM and are read by program_id(0).
# ----------------------------------------------------------------------------
def _add_noise_kernel(c0_ref, c1_ref, lat_ref, noise_ref, o_ref):
    i = pl.program_id(0)                 # sample index
    c0 = c0_ref[i]
    c1 = c1_ref[i]
    o_ref[...] = (c0 * lat_ref[...].astype(jnp.float32)
                  + c1 * noise_ref[...].astype(jnp.float32)).astype(o_ref.dtype)


def add_noise_pallas(latents, noise, c0, c1, max_rows=1024, max_cols=512):
    b = latents.shape[0]
    lat2 = latents.reshape(b, -1)
    f = lat2.shape[1]
    cols = _lane_dense_factor(f, max_cols)
    rows = f // cols
    lat = lat2.reshape(b, rows, cols)
    nz = noise.reshape(b, rows, cols)
    row_tile = rows if rows <= max_rows else max_rows

    out = pl.pallas_call(
        _add_noise_kernel,
        out_shape=jax.ShapeDtypeStruct((b, rows, cols), latents.dtype),
        grid=(b, pl.cdiv(rows, row_tile)),
        in_specs=[
            pl.BlockSpec(memory_space=pltpu.MemorySpace.SMEM),        # c0 (B,)
            pl.BlockSpec(memory_space=pltpu.MemorySpace.SMEM),        # c1 (B,)
            pl.BlockSpec((1, row_tile, cols), lambda i, j: (i, j, 0)),
            pl.BlockSpec((1, row_tile, cols), lambda i, j: (i, j, 0)),
        ],
        out_specs=pl.BlockSpec((1, row_tile, cols), lambda i, j: (i, j, 0)),
        compiler_params=pltpu.CompilerParams(
            dimension_semantics=("parallel", "parallel")),
    )(c0.reshape(b).astype(jnp.float32), c1.reshape(b).astype(jnp.float32),
      lat, nz)
    return out.reshape(latents.shape)


# ----------------------------------------------------------------------------
# Kernel 4: MSE loss (mean).  Fully flattened lane-dense layout, grid over row
# tiles; a VMEM elementwise accumulator per step (pure VPU adds), single
# cross-lane/sublane reduce + divide only at finalize, scalar out in SMEM.
# ----------------------------------------------------------------------------
def _mse_kernel(p_ref, t_ref, o_ref, acc_ref, *, total_rows, row_tile,
                inv_total):
    j = pl.program_id(0)

    @pl.when(j == 0)
    def _():
        acc_ref[...] = jnp.zeros_like(acc_ref)

    d = p_ref[...].astype(jnp.float32) - t_ref[...].astype(jnp.float32)
    # Mask the ragged last row tile (padded reads must not enter the sum).
    row = jax.lax.broadcasted_iota(jnp.int32, d.shape, 0) + j * row_tile
    d = jnp.where(row < total_rows, d, 0.0)
    acc_ref[...] = acc_ref[...] + d * d          # elementwise accumulate (VPU)

    @pl.when(j == pl.num_programs(0) - 1)
    def _():
        o_ref[0, 0] = jnp.sum(acc_ref[...]) * inv_total


def mse_loss_pallas(pred, target, max_rows=512, max_cols=512):
    total = pred.size
    cols = _lane_dense_factor(total, max_cols)
    rows = total // cols
    p = pred.reshape(rows, cols)
    t = target.reshape(rows, cols)
    row_tile = rows if rows <= max_rows else max_rows

    kern = functools.partial(_mse_kernel, total_rows=rows, row_tile=row_tile,
                             inv_total=1.0 / float(total))
    loss = pl.pallas_call(
        kern,
        out_shape=jax.ShapeDtypeStruct((1, 1), jnp.float32),
        grid=(pl.cdiv(rows, row_tile),),
        in_specs=[
            pl.BlockSpec((row_tile, cols), lambda j: (j, 0)),
            pl.BlockSpec((row_tile, cols), lambda j: (j, 0)),
        ],
        out_specs=pl.BlockSpec((1, 1), lambda j: (0, 0),
                               memory_space=pltpu.MemorySpace.SMEM),
        scratch_shapes=[pltpu.VMEM((row_tile, cols), jnp.float32)],
        compiler_params=pltpu.CompilerParams(dimension_semantics=("arbitrary",)),
    )(p, t)
    return loss[0, 0]


# ----------------------------------------------------------------------------
# Parameter init (deterministic, synthetic).  fc weights pre-cast to bf16 once
# so no per-forward convert op reads the f32 weights from HBM.
# ----------------------------------------------------------------------------
def init_mlp_ln_params(key, in_dim, hidden, out_dim):
    k1, k2 = jax.random.split(key)
    return {
        "ln1_g": jnp.ones((1, in_dim), jnp.float32),
        "ln1_b": jnp.zeros((1, in_dim), jnp.float32),
        "w1": (jax.random.normal(k1, (in_dim, hidden), jnp.float32)
               * 0.02).astype(jnp.bfloat16),
        "b1": jnp.zeros((1, hidden), jnp.float32),
        "w2": (jax.random.normal(k2, (hidden, out_dim), jnp.float32)
               * 0.02).astype(jnp.bfloat16),
        "b2": jnp.zeros((1, out_dim), jnp.float32),
        "ln2_g": jnp.ones((1, out_dim), jnp.float32),
        "ln2_b": jnp.zeros((1, out_dim), jnp.float32),
    }


# ----------------------------------------------------------------------------
# IDAvatarModel.forward (Pallas version of its own compute)
# ----------------------------------------------------------------------------
def idavatar_forward(latents, noise, timesteps, encoder_hidden_states,
                     object_embeds, patch_features, image_token_mask,
                     unet_pred, concept_params, patch_params, alphas_cumprod):
    b = latents.shape[0]

    # patch_mlp(patch_features): (B, P, 1280) -> (B, P, D)
    pf = patch_features
    pf2 = mlp_layernorm(pf.reshape(-1, pf.shape[-1]), patch_params,
                        use_residual=False)
    pf2 = pf2.reshape(pf.shape[0], pf.shape[1], -1)

    # concept_mlp(object_embeds) + post_fuse(...) in a single fused launch.
    ehs = concept_post_fuse_pallas(encoder_hidden_states, object_embeds,
                                   image_token_mask, concept_params)

    # noisy_latents = noise_scheduler.add_noise(latents, noise, timesteps)
    acp = alphas_cumprod[timesteps]
    c0 = jnp.sqrt(acp)
    c1 = jnp.sqrt(1.0 - acp)
    noisy = add_noise_pallas(latents, noise, c0, c1)

    # TODO(synk): pred = self.unet(noisy_latents, timesteps, ehs, pf2) is an
    # external pretrained UNet/ControlNet; `unet_pred` is a deterministic
    # stand-in of the same shape (this also prevents fusing add_noise+mse).
    target = noise  # prediction_type == 'epsilon'
    loss = mse_loss_pallas(unet_pred, target)

    return {
        "denoise_loss": loss,
        "encoder_hidden_states": ehs,
        "patch_features": pf2,
        "noisy_latents": noisy,
    }


if __name__ == "__main__":
    key = jax.random.PRNGKey(0)
    keys = jax.random.split(key, 10)

    # Small synthetic shapes consistent with the forward pass.
    B, S, D = 2, 16, 128          # batch, text seq len, text hidden (embed_dim)
    C, H, W = 4, 8, 8             # latent channels / spatial (VAE latent space)
    P, PATCH_DIM = 8, 1280        # ViT patch tokens, ViT-H patch feature width

    # Stand-ins for external encoders (TODO(synk): see header).
    latents = jax.random.normal(keys[0], (B, C, H, W), jnp.float32) * 0.18215
    noise = jax.random.normal(keys[1], (B, C, H, W), jnp.float32)
    timesteps = jax.random.randint(keys[2], (B,), 0, 1000)
    encoder_hidden_states = jax.random.normal(keys[3], (B, S, D), jnp.float32)
    object_embeds = jax.random.normal(keys[4], (B, 1, D), jnp.float32)
    patch_features = jax.random.normal(keys[5], (B, P, PATCH_DIM), jnp.float32)
    unet_pred = jax.random.normal(keys[6], (B, C, H, W), jnp.float32)

    # exactly one image-token position per example (obj_seq_length == 1)
    image_token_mask = (jnp.zeros((B, S), jnp.bool_)
                        .at[0, 3].set(True)
                        .at[1, 5].set(True))

    concept_params = init_mlp_ln_params(keys[7], D, D, D)          # ConceptMLP
    patch_params = init_mlp_ln_params(keys[8], PATCH_DIM, D, D)    # PatchMLP

    # DDPM linear beta schedule coefficients (noise_scheduler.add_noise).
    betas = jnp.linspace(1e-4, 0.02, 1000, dtype=jnp.float32)
    alphas_cumprod = jnp.cumprod(1.0 - betas)

    out = idavatar_forward(latents, noise, timesteps, encoder_hidden_states,
                           object_embeds, patch_features, image_token_mask,
                           unet_pred, concept_params, patch_params,
                           alphas_cumprod)
    jax.block_until_ready(out)
    print("KERNEL_OK")
</pallas_src>

<mosaic_0001>
module attributes {stable_mosaic.version = 11 : i64} {
  func.func @_mlp_ln_kernel(%arg0: i32, %arg1: memref<16x1280xf32, #tpu.memory_space<vmem>>, %arg2: memref<1x1280xf32, #tpu.memory_space<vmem>>, %arg3: memref<1x1280xf32, #tpu.memory_space<vmem>>, %arg4: memref<1280x128xbf16, #tpu.memory_space<vmem>>, %arg5: memref<1x128xf32, #tpu.memory_space<vmem>>, %arg6: memref<128x128xbf16, #tpu.memory_space<vmem>>, %arg7: memref<1x128xf32, #tpu.memory_space<vmem>>, %arg8: memref<1x128xf32, #tpu.memory_space<vmem>>, %arg9: memref<1x128xf32, #tpu.memory_space<vmem>>, %arg10: memref<16x128xf32, #tpu.memory_space<vmem>>) attributes {dimension_semantics = [#tpu.dimension_semantics<parallel>], iteration_bounds = array<i64: 1>, scalar_prefetch = 0 : i64, scratch_operands = 0 : i64, tpu.core_type = #tpu.core_type<tc>, window_params = [{transform_indices = @transform_0, window_bounds = array<i64: 16, 1280>}, {pipeline_mode = #tpu.pipeline_mode<synchronous>, transform_indices = @transform_1, window_bounds = array<i64: 1, 1280>}, {pipeline_mode = #tpu.pipeline_mode<synchronous>, transform_indices = @transform_2, window_bounds = array<i64: 1, 1280>}, {pipeline_mode = #tpu.pipeline_mode<synchronous>, transform_indices = @transform_3, window_bounds = array<i64: 1280, 128>}, {pipeline_mode = #tpu.pipeline_mode<synchronous>, transform_indices = @transform_4, window_bounds = array<i64: 1, 128>}, {pipeline_mode = #tpu.pipeline_mode<synchronous>, transform_indices = @transform_5, window_bounds = array<i64: 128, 128>}, {pipeline_mode = #tpu.pipeline_mode<synchronous>, transform_indices = @transform_6, window_bounds = array<i64: 1, 128>}, {pipeline_mode = #tpu.pipeline_mode<synchronous>, transform_indices = @transform_7, window_bounds = array<i64: 1, 128>}, {pipeline_mode = #tpu.pipeline_mode<synchronous>, transform_indices = @transform_8, window_bounds = array<i64: 1, 128>}, {transform_indices = @transform_9, window_bounds = array<i64: 16, 128>}]} {
    %c0 = arith.constant 0 : index
    %c0_0 = arith.constant 0 : index
    %0 = vector.load %arg1[%c0, %c0_0] : memref<16x1280xf32, #tpu.memory_space<vmem>>, vector<16x1280xf32>
    %cst = arith.constant dense<0.000000e+00> : vector<16xf32>
    %1 = vector.multi_reduction <add>, %0, %cst [1] : vector<16x1280xf32> to vector<16xf32>
    %2 = vector.shape_cast %1 : vector<16xf32> to vector<16x1xf32>
    %cst_1 = arith.constant 1.280000e+03 : f32
    %3 = vector.broadcast %cst_1 : f32 to vector<16x1xf32>
    %4 = arith.divf %2, %3 : vector<16x1xf32>
    %5 = vector.broadcast %4 : vector<16x1xf32> to vector<16x1280xf32>
    %6 = arith.subf %0, %5 : vector<16x1280xf32>
    %7 = arith.mulf %6, %6 : vector<16x1280xf32>
    %cst_2 = arith.constant dense<0.000000e+00> : vector<16xf32>
    %8 = vector.multi_reduction <add>, %7, %cst_2 [1] : vector<16x1280xf32> to vector<16xf32>
    %9 = vector.shape_cast %8 : vector<16xf32> to vector<16x1xf32>
    %cst_3 = arith.constant 1.280000e+03 : f32
    %10 = vector.broadcast %cst_3 : f32 to vector<16x1xf32>
    %11 = arith.divf %9, %10 : vector<16x1xf32>
    %12 = vector.broadcast %4 : vector<16x1xf32> to vector<16x1280xf32>
    %13 = arith.subf %0, %12 : vector<16x1280xf32>
    %cst_4 = arith.constant 9.99999974E-6 : f32
    %14 = vector.broadcast %cst_4 : f32 to vector<16x1xf32>
    %15 = arith.addf %11, %14 : vector<16x1xf32>
    %16 = math.rsqrt %15 : vector<16x1xf32>
    %17 = vector.broadcast %16 : vector<16x1xf32> to vector<16x1280xf32>
    %18 = arith.mulf %13, %17 : vector<16x1280xf32>
    %c0_5 = arith.constant 0 : index
    %c0_6 = arith.constant 0 : index
    %19 = vector.load %arg2[%c0_5, %c0_6] : memref<1x1280xf32, #tpu.memory_space<vmem>>, vector<1x1280xf32>
    %20 = vector.broadcast %19 : vector<1x1280xf32> to vector<16x1280xf32>
    %21 = arith.mulf %18, %20 : vector<16x1280xf32>
    %c0_7 = arith.constant 0 : index
    %c0_8 = arith.constant 0 : index
    %22 = vector.load %arg3[%c0_7, %c0_8] : memref<1x1280xf32, #tpu.memory_space<vmem>>, vector<1x1280xf32>
    %23 = vector.broadcast %22 : vector<1x1280xf32> to vector<16x1280xf32>
    %24 = arith.addf %21, %23 : vector<16x1280xf32>
    %25 = arith.truncf %24 : vector<16x1280xf32> to vector<16x1280xbf16>
    %c0_9 = arith.constant 0 : index
    %c0_10 = arith.constant 0 : index
    %26 = vector.load %arg4[%c0_9, %c0_10] : memref<1280x128xbf16, #tpu.memory_space<vmem>>, vector<1280x128xbf16>
    %cst_11 = arith.constant dense<0.000000e+00> : vector<16x128xf32>
    %27 = tpu.matmul %25, %26, %cst_11 {dimension_numbers = #tpu.dot_dimension_numbers<[1], [0], [0], [1], [0, 0, 1, 1], [], []>} : vector<16x1280xbf16>, vector<1280x128xbf16>, vector<16x128xf32> -> vector<16x128xf32>
    %c0_12 = arith.constant 0 : index
    %c0_13 = arith.constant 0 : index
    %28 = vector.load %arg5[%c0_12, %c0_13] : memref<1x128xf32, #tpu.memory_space<vmem>>, vector<1x128xf32>
    %29 = vector.broadcast %28 : vector<1x128xf32> to vector<16x128xf32>
    %30 = arith.addf %27, %29 : vector<16x128xf32>
    %cst_14 = arith.constant 5.000000e-01 : f32
    %31 = vector.broadcast %cst_14 : f32 to vector<16x128xf32>
    %32 = arith.mulf %31, %30 : vector<16x128xf32>
    %cst_15 = arith.constant 0.707106769 : f32
    %33 = vector.broadcast %cst_15 : f32 to vector<16x128xf32>
    %34 = arith.mulf %30, %33 : vector<16x128xf32>
    %35 = math.erf %34 : vector<16x128xf32>
    %cst_16 = arith.constant 1.000000e+00 : f32
    %36 = vector.broadcast %cst_16 : f32 to vector<16x128xf32>
    %37 = arith.addf %36, %35 : vector<16x128xf32>
    %38 = arith.mulf %32, %37 : vector<16x128xf32>
    %39 = arith.truncf %38 : vector<16x128xf32> to vector<16x128xbf16>
    %c0_17 = arith.constant 0 : index
    %c0_18 = arith.constant 0 : index
    %40 = vector.load %arg6[%c0_17, %c0_18] : memref<128x128xbf16, #tpu.memory_space<vmem>>, vector<128x128xbf16>
    %cst_19 = arith.constant dense<0.000000e+00> : vector<16x128xf32>
    %41 = tpu.matmul %39, %40, %cst_19 {dimension_numbers = #tpu.dot_dimension_numbers<[1], [0], [0], [1], [0, 0, 1, 1], [], []>} : vector<16x128xbf16>, vector<128x128xbf16>, vector<16x128xf32> -> vector<16x128xf32>
    %c0_20 = arith.constant 0 : index
    %c0_21 = arith.constant 0 : index
    %42 = vector.load %arg7[%c0_20, %c0_21] : memref<1x128xf32, #tpu.memory_space<vmem>>, vector<1x128xf32>
    %43 = vector.broadcast %42 : vector<1x128xf32> to vector<16x128xf32>
    %44 = arith.addf %41, %43 : vector<16x128xf32>
    %cst_22 = arith.constant dense<0.000000e+00> : vector<16xf32>
    %45 = vector.multi_reduction <add>, %44, %cst_22 [1] : vector<16x128xf32> to vector<16xf32>
    %46 = vector.shape_cast %45 : vector<16xf32> to vector<16x1xf32>
    %cst_23 = arith.constant 1.280000e+02 : f32
    %47 = vector.broadcast %cst_23 : f32 to vector<16x1xf32>
    %48 = arith.divf %46, %47 : vector<16x1xf32>
    %49 = vector.broadcast %48 : vector<16x1xf32> to vector<16x128xf32>
    %50 = arith.subf %44, %49 : vector<16x128xf32>
    %51 = arith.mulf %50, %50 : vector<16x128xf32>
    %cst_24 = arith.constant dense<0.000000e+00> : vector<16xf32>
    %52 = vector.multi_reduction <add>, %51, %cst_24 [1] : vector<16x128xf32> to vector<16xf32>
    %53 = vector.shape_cast %52 : vector<16xf32> to vector<16x1xf32>
    %cst_25 = arith.constant 1.280000e+02 : f32
    %54 = vector.broadcast %cst_25 : f32 to vector<16x1xf32>
    %55 = arith.divf %53, %54 : vector<16x1xf32>
    %56 = vector.broadcast %48 : vector<16x1xf32> to vector<16x128xf32>
    %57 = arith.subf %44, %56 : vector<16x128xf32>
    %cst_26 = arith.constant 9.99999974E-6 : f32
    %58 = vector.broadcast %cst_26 : f32 to vector<16x1xf32>
    %59 = arith.addf %55, %58 : vector<16x1xf32>
    %60 = math.rsqrt %59 : vector<16x1xf32>
    %61 = vector.broadcast %60 : vector<16x1xf32> to vector<16x128xf32>
    %62 = arith.mulf %57, %61 : vector<16x128xf32>
    %c0_27 = arith.constant 0 : index
    %c0_28 = arith.constant 0 : index
    %63 = vector.load %arg8[%c0_27, %c0_28] : memref<1x128xf32, #tpu.memory_space<vmem>>, vector<1x128xf32>
    %64 = vector.broadcast %63 : vector<1x128xf32> to vector<16x128xf32>
    %65 = arith.mulf %62, %64 : vector<16x128xf32>
    %c0_29 = arith.constant 0 : index
    %c0_30 = arith.constant 0 : index
    %66 = vector.load %arg9[%c0_29, %c0_30] : memref<1x128xf32, #tpu.memory_space<vmem>>, vector<1x128xf32>
    %67 = vector.broadcast %66 : vector<1x128xf32> to vector<16x128xf32>
    %68 = arith.addf %65, %67 : vector<16x128xf32>
    %c0_31 = arith.constant 0 : index
    %c0_32 = arith.constant 0 : index
    %69 = vector.load %arg10[%c0_31, %c0_32] : memref<16x128xf32, #tpu.memory_space<vmem>>, vector<16x128xf32>
    tpu.vector_store %arg10[%c0_31, %c0_32], %68 {strides = array<i32>} : memref<16x128xf32, #tpu.memory_space<vmem>>, vector<16x128xf32>,
    return
  }
  func.func @transform_0(%arg0: i32) -> (i32, i32) {
    %c0_i32 = arith.constant 0 : i32
    %c0_i32_0 = arith.constant 0 : i32
    return %arg0, %c0_i32 : i32, i32
  }
  func.func @transform_1(%arg0: i32) -> (i32, i32) {
    %c0_i32 = arith.constant 0 : i32
    %c0_i32_0 = arith.constant 0 : i32
    %c0_i32_1 = arith.constant 0 : i32
    return %c0_i32, %c0_i32_0 : i32, i32
  }
  func.func @transform_2(%arg0: i32) -> (i32, i32) {
    %c0_i32 = arith.constant 0 : i32
    %c0_i32_0 = arith.constant 0 : i32
    %c0_i32_1 = arith.constant 0 : i32
    return %c0_i32, %c0_i32_0 : i32, i32
  }
  func.func @transform_3(%arg0: i32) -> (i32, i32) {
    %c0_i32 = arith.constant 0 : i32
    %c0_i32_0 = arith.constant 0 : i32
    %c0_i32_1 = arith.constant 0 : i32
    return %c0_i32, %c0_i32_0 : i32, i32
  }
  func.func @transform_4(%arg0: i32) -> (i32, i32) {
    %c0_i32 = arith.constant 0 : i32
    %c0_i32_0 = arith.constant 0 : i32
    %c0_i32_1 = arith.constant 0 : i32
    return %c0_i32, %c0_i32_0 : i32, i32
  }
  func.func @transform_5(%arg0: i32) -> (i32, i32) {
    %c0_i32 = arith.constant 0 : i32
    %c0_i32_0 = arith.constant 0 : i32
    %c0_i32_1 = arith.constant 0 : i32
    return %c0_i32, %c0_i32_0 : i32, i32
  }
  func.func @transform_6(%arg0: i32) -> (i32, i32) {
    %c0_i32 = arith.constant 0 : i32
    %c0_i32_0 = arith.constant 0 : i32
    %c0_i32_1 = arith.constant 0 : i32
    return %c0_i32, %c0_i32_0 : i32, i32
  }
  func.func @transform_7(%arg0: i32) -> (i32, i32) {
    %c0_i32 = arith.constant 0 : i32
    %c0_i32_0 = arith.constant 0 : i32
    %c0_i32_1 = arith.constant 0 : i32
    return %c0_i32, %c0_i32_0 : i32, i32
  }
  func.func @transform_8(%arg0: i32) -> (i32, i32) {
    %c0_i32 = arith.constant 0 : i32
    %c0_i32_0 = arith.constant 0 : i32
    %c0_i32_1 = arith.constant 0 : i32
    return %c0_i32, %c0_i32_0 : i32, i32
  }
  func.func @transform_9(%arg0: i32) -> (i32, i32) {
    %c0_i32 = arith.constant 0 : i32
    %c0_i32_0 = arith.constant 0 : i32
    return %arg0, %c0_i32 : i32, i32
  }
}

</mosaic_0001>

<bundles_post_ra>
// kernel: tpu_custom_call.1
= control target key start
LH: loop header
LB: loop body
LE: loop exit
PB: predicated region body
PF: predicated region fallthrough
CT: control target
= control target key end

     0   :  { %14 = vsyncpa [#allocation3], 0  ;;  %s2283_s0 = inlined_call_operand.hbm [shape: f32[16,1280], index: 0, kind: input, shape index: {}]   ;;  %s2284_s1 = inlined_call_operand.hbm [shape: f32[1,1280], index: 1, kind: input, shape index: {}]   ;;  %s2285_s2 = inlined_call_operand.hbm [shape: f32[1,1280], index: 2, kind: input, shape index: {}]   ;;  %s2286_s3 = inlined_call_operand.hbm [shape: bf16[1280,128], index: 3, kind: input, shape index: {}]   ;;  %s2287_s4 = inlined_call_operand.vmem [shape: f32[1,128], index: 4, kind: input, shape index: {}]   ;;  %s2288_s5 = inlined_call_operand.hbm [shape: bf16[128,128], index: 5, kind: input, shape index: {}]   ;;  %s2289_s6 = inlined_call_operand.vmem [shape: f32[1,128], index: 6, kind: input, shape index: {}]   ;;  %s2290_s7 = inlined_call_operand.vmem [shape: f32[1,128], index: 7, kind: input, shape index: {}]   ;;  %s2291_s8 = inlined_call_operand.vmem [shape: f32[1,128], index: 8, kind: input, shape index: {}]   ;;  %s2292_s9 = inlined_call_operand.hbm [shape: f32[16,128], index: 9, kind: output, shape index: {}]  }
   0x1   :  { %15 = vsyncpa [#allocation6], 0 }
   0x2   :  { %16 = vsyncpa [#allocation9], 0 }
   0x3   :  { %17 = vsyncpa [#allocation4], 0  ;;  %s1911_s30 = smov [#allocation5]   ;;  %s1912_s11 = smov [#allocation8]  }
   0x4   :  { %s36_s10 = sshll.u32 %s1911_s30, 4  ;;  %s55_s12 = sshll.u32 %s1912_s11, 4  ;;  %s37_s10 = int_to_ptr.vmem [resolvable:$true] %s36_s10  ;;  %s1975_s12 = int_to_ptr.vmem [resolvable:$true] %s55_s12 }
   0x5   :  { %s1771_s15 = scalar_lea.hbm %s2284_s1, 160 }
   0x6   :  { %p1772_p0 = scmp.ne.s32.totalorder %s2284_s1, %s1771_s15  ;;  %p1775_p1 = scmp.lt.u32.totalorder %s1771_s15, %s2284_s1 }
   0x8   :  { %p1777_p2 = pnand %p1775_p1, %p1772_p0 }
   0xa   :  { %1780 = shalt.err (!%p1777_p2)
}
   0xb   :  { %s1781_s20 = scalar_lea.vmem %s37_s10, 160  ;;  %p1786_p4 = scmp.lt.s32.totalorder %s37_s10, %s37_s10 }
   0xc   :  { %p1782_p3 = scmp.ne.s32.totalorder %s37_s10, %s1781_s20  ;;  %p1787_p5 = scmp.lt.s32.totalorder %s1781_s20, %s1781_s20 }
   0xe   :  { %p1788_p6 = por %p1787_p5, %p1786_p4 }
  0x10   :  { %p1789_p7 = pnand %p1788_p6, %p1782_p3 }
  0x12   :  { %1792 = shalt.err (!%p1789_p7)
}
  0x13   :  { %39 = dma.hbm_to_vmem [thread:$0]  %s2284_s1, 160, %s37_s10, [#allocation6]  }
  0x14   :  { %s1793_s25 = scalar_lea.hbm %s2286_s3, 10240 }
  0x15   :  { %p1794_p8 = scmp.ne.s32.totalorder %s2286_s3, %s1793_s25  ;;  %p1797_p9 = scmp.lt.u32.totalorder %s1793_s25, %s2286_s3 }
  0x17   :  { %p1799_p10 = pnand %p1797_p9, %p1794_p8 }
  0x19   :  { %1802 = shalt.err (!%p1799_p10)
}
  0x1a   :  { %s1803_s30 = scalar_lea.vmem %s1975_s12, 10240  ;;  %p1808_p12 = scmp.lt.s32.totalorder %s1975_s12, %s1975_s12 }
  0x1b   :  { %p1804_p11 = scmp.ne.s32.totalorder %s1975_s12, %s1803_s30  ;;  %p1809_p13 = scmp.lt.s32.totalorder %s1803_s30, %s1803_s30 }
  0x1d   :  { %p1810_p0 = por %p1809_p13, %p1808_p12 }
  0x1f   :  { %p1811_p1 = pnand %p1810_p0, %p1804_p11 }
  0x21   :  { %1814 = shalt.err (!%p1811_p1)
}
  0x22   :  { %s1913_s1 = smov 64   ;;  %s1914_s10 = smov 4  }
  0x23   :  { %61 = dma.hbm_to_vmem [thread:$0]  %s2286_s3, 10240, %s1975_s12, [#allocation9], %s1913_s1, %s1913_s1, %s1914_s10  }
  0x24   :  { %s1915_s14 = smov [#allocation2]   ;;  %s1815_s18 = scalar_lea.hbm %s2283_s0, 2560 }
  0x25   :  { %s23_s15 = sshll.u32 %s1915_s14, 4  ;;  %p1816_p2 = scmp.ne.s32.totalorder %s2283_s0, %s1815_s18  ;;  %s24_s15 = int_to_ptr.vmem [resolvable:$true] %s23_s15 }
  0x26   :  { %p1819_p3 = scmp.lt.u32.totalorder %s1815_s18, %s2283_s0 }
  0x28   :  { %p1821_p4 = pnand %p1819_p3, %p1816_p2 }
  0x2a   :  { %1824 = shalt.err (!%p1821_p4)
}
  0x2b   :  { %s1825_s23 = scalar_lea.vmem %s24_s15, 2560  ;;  %p1830_p6 = scmp.lt.s32.totalorder %s24_s15, %s24_s15 }
  0x2c   :  { %p1826_p5 = scmp.ne.s32.totalorder %s24_s15, %s1825_s23  ;;  %p1831_p7 = scmp.lt.s32.totalorder %s1825_s23, %s1825_s23 }
  0x2e   :  { %p1832_p8 = por %p1831_p7, %p1830_p6 }
  0x30   :  { %p1833_p9 = pnand %p1832_p8, %p1826_p5 }
  0x32   :  { %1836 = shalt.err (!%p1833_p9)
}
  0x33   :  { %s1916_s3 = smov 1280   ;;  %s1917_s12 = smov 80  }
  0x34   :  { %29 = dma.hbm_to_vmem [thread:$0]  %s2283_s0, 2560, %s24_s15, [#allocation3], %s1916_s3, %s1916_s3, %s1917_s12  }
  0x35   :  { %s1918_s26 = smov [#allocation7]   ;;  %s1919_s28 = smov [#allocation10]  }
  0x36   :  { %s46_s27 = sshll.u32 %s1918_s26, 4  ;;  %s69_s29 = sshll.u32 %s1919_s28, 4  ;;  %s47_s27 = int_to_ptr.vmem [resolvable:$true] %s46_s27  ;;  %s70_s29 = int_to_ptr.vmem [resolvable:$true] %s69_s29 }
  0x37   :  { %s1837_s13 = scalar_lea.hbm %s2285_s2, 160 }
  0x38   :  { %p1838_p10 = scmp.ne.s32.totalorder %s2285_s2, %s1837_s13  ;;  %p1841_p11 = scmp.lt.u32.totalorder %s1837_s13, %s2285_s2 }
  0x3a   :  { %p1843_p12 = pnand %p1841_p11, %p1838_p10 }
  0x3c   :  { %1846 = shalt.err (!%p1843_p12)
}
  0x3d   :  { %s1847_s0 = scalar_lea.vmem %s47_s27, 160  ;;  %p1852_p0 = scmp.lt.s32.totalorder %s47_s27, %s47_s27 }
  0x3e   :  { %p1848_p13 = scmp.ne.s32.totalorder %s47_s27, %s1847_s0  ;;  %p1853_p1 = scmp.lt.s32.totalorder %s1847_s0, %s1847_s0 }
  0x40   :  { %p1854_p2 = por %p1853_p1, %p1852_p0 }
  0x42   :  { %p1855_p3 = pnand %p1854_p2, %p1848_p13 }
  0x44   :  { %1858 = shalt.err (!%p1855_p3)
}
  0x45   :  { %49 = dma.hbm_to_vmem [thread:$0]  %s2285_s2, 160, %s47_s27, [#allocation6]  }
  0x46   :  { %s1859_s22 = scalar_lea.hbm %s2288_s5, 1024 }
  0x47   :  { %p1860_p4 = scmp.ne.s32.totalorder %s2288_s5, %s1859_s22  ;;  %p1863_p5 = scmp.lt.u32.totalorder %s1859_s22, %s2288_s5 }
  0x49   :  { %p1865_p6 = pnand %p1863_p5, %p1860_p4 }
  0x4b   :  { %1868 = shalt.err (!%p1865_p6)
}
  0x4c   :  { %s1869_s25 = scalar_lea.vmem %s70_s29, 1024  ;;  %p1874_p8 = scmp.lt.s32.totalorder %s70_s29, %s70_s29 }
  0x4d   :  { %p1870_p7 = scmp.ne.s32.totalorder %s70_s29, %s1869_s25  ;;  %p1875_p9 = scmp.lt.s32.totalorder %s1869_s25, %s1869_s25 }
  0x4f   :  { %p1876_p10 = por %p1875_p9, %p1874_p8 }
  0x51   :  { %p1877_p11 = pnand %p1876_p10, %p1870_p7 }
  0x53   :  { %1880 = shalt.err (!%p1877_p11)
}
  0x54   :  { %75 = dma.hbm_to_vmem [thread:$0]  %s2288_s5, 1024, %s70_s29, [#allocation9], %s1913_s1, %s1913_s1, %s1914_s10  }
  0x55   :  { %1903 = dma.done.wait [#allocation3], 2560  }
  0x56   :  { %1904 = vsyncadd [#allocation3], 4294964736 }
  0x57   :  { %1905 = dma.done.wait [#allocation6], 320  }
  0x58   :  { %1906 = vsyncadd [#allocation6], 4294966976 }
  0x59   :  { %1907 = dma.done.wait [#allocation9], 11264  }
  0x5a   :  { %1908 = vsyncadd [#allocation9], 4294956032  ;;  %v98_v0 = vld [vmem:[#allocation2] sm:$0xff]  ;;  %v99_v1 = vld [vmem:[#allocation2 + $0x8] sm:$0xff]  ;;  %vm1921_vm0 = vmmov 0   ;;  %s1922_s30 = smov [#allocation11]  }
  0x5b   :  { %v100_v2 = vld [vmem:[#allocation2 + $0x10] sm:$0xff]  ;;  %v118_v3 = vadd.f32 %v99_v1, %v98_v0  ;;  %v101_v4 = vld [vmem:[#allocation2 + $0x18] sm:$0xff]  ;;  %v102_v8 = vld [vmem:[#allocation2 + $0x20] sm:$0xff]  ;;  %s1412_s11 = sshll.u32 %s1922_s30, 4  ;;  %s1413_s11 = int_to_ptr.vmem [resolvable:$true] %s1412_s11 }
  0x5c   :  { %v108_v6 = vld [vmem:[#allocation2 + $0x50] sm:$0xff]  ;;  %v109_v7 = vld [vmem:[#allocation2 + $0x58] sm:$0xff]  ;;  %v110_v9 = vld [vmem:[#allocation2 + $0x60] sm:$0xff]  ;;  %s1881_s13 = scalar_lea.vmem %s1413_s11, 256  ;;  %p1886_p13 = scmp.lt.s32.totalorder %s1413_s11, %s1413_s11 }
  0x5d   :  { %v119_v5 = vadd.f32 %v118_v3, %v100_v2  ;;  %v129_v10 = vadd.f32 %v109_v7, %v108_v6  ;;  %v103_v11 = vld [vmem:[#allocation2 + $0x28] sm:$0xff]  ;;  %v104_v14 = vld [vmem:[#allocation2 + $0x30] sm:$0xff]  ;;  %v2052_v18 = vld [vmem:[#allocation2 + $0x78] sm:$0xff]  ;;  %p1882_p12 = scmp.ne.s32.totalorder %s1413_s11, %s1881_s13  ;;  %p1887_p0 = scmp.lt.s32.totalorder %s1881_s13, %s1881_s13 }
  0x5e   :  { %v2048_v13 = vld [vmem:[#allocation2 + $0x68] sm:$0xff]  ;;  %v2050_v15 = vld [vmem:[#allocation2 + $0x70] sm:$0xff]  ;;  %v105_v19 = vld [vmem:[#allocation2 + $0x38] sm:$0xff] }
  0x5f   :  { %v120_v12 = vadd.f32 %v119_v5, %v101_v4  ;;  %v130_v16 = vadd.f32 %v129_v10, %v110_v9  ;;  %v2055_v22 = vld [vmem:[#allocation2 + $0x80] sm:$0xff]  ;;  %v2058_v26 = vld [vmem:[#allocation2 + $0x88] sm:$0xff]  ;;  %v2061_v30 = vld [vmem:[#allocation2 + $0x90] sm:$0xff]  ;;  %p1888_p1 = por %p1887_p0, %p1886_p13 }
  0x60   :  { %v106_v23 = vld [vmem:[#allocation2 + $0x40] sm:$0xff]  ;;  %v107_v27 = vld [vmem:[#allocation2 + $0x48] sm:$0xff]  ;;  %v2064_v33 = vld [vmem:[#allocation2 + $0x98] sm:$0xff] }
  0x61   :  { %v121_v17 = vadd.f32 %v120_v12, %v102_v8  ;;  %v131_v20 = vadd.f32 %v130_v16, %v2048_v13  ;;  %v1671_v38 = vld [vmem:[#allocation8 + $0x40] sm:$0xff]   ;;  %v1675_v42 = vld [vmem:[#allocation8 + $0x48] sm:$0xff]   ;;  %p1889_p2 = pnand %p1888_p1, %p1882_p12 }
  0x62   :  { %v1672_v39 = vld [vmem:[#allocation8 + $0xc0] sm:$0xff]   ;;  %v1676_v43 = vld [vmem:[#allocation8 + $0xc8] sm:$0xff]   ;;  %1518 = vmatprep.subr.bf16.mxu0 %v1671_v38 }
  0x63   :  { %v122_v21 = vadd.f32 %v121_v17, %v103_v11  ;;  %v132_v24 = vadd.f32 %v131_v20, %v2050_v15  ;;  %v1673_v40 = vld [vmem:[#allocation8] sm:$0xff]   ;;  %1540 = vmatprep.subr.bf16.mxu1 %v1672_v39 }
  0x64   :  { %v1674_v41 = vld [vmem:[#allocation8 + $0x80] sm:$0xff]   ;;  %1519 = vmatpush3.bf16.msra.mxu0 %v1673_v40 }
  0x65   :  { %v123_v25 = vadd.f32 %v122_v21, %v104_v14  ;;  %v133_v28 = vadd.f32 %v132_v24, %v2052_v18  ;;  %1541 = vmatpush3.bf16.msra.mxu1 %v1674_v41  ;;  %1520 = vmatprep.subr.bf16.mxu0 %v1675_v42 }
  0x66   :  { %1542 = vmatprep.subr.bf16.mxu1 %v1676_v43  ;;  %v1677_v43 = vld [vmem:[#allocation8 + $0x8] sm:$0xff]  }
  0x67   :  { %v124_v29 = vadd.f32 %v123_v25, %v105_v19  ;;  %v134_v31 = vadd.f32 %v133_v28, %v2055_v22 }
  0x68   :  { %1521 = vmatpush3.bf16.msra.mxu0 %v1677_v43 }
  0x69   :  { %v125_v32 = vadd.f32 %v124_v29, %v106_v23  ;;  %v135_v34 = vadd.f32 %v134_v31, %v2058_v26 }
  0x6b   :  { %v126_v35 = vadd.f32 %v125_v32, %v107_v27  ;;  %v136_v36 = vadd.f32 %v135_v34, %v2061_v30 }
  0x6d   :  { %127 = vadd.xlane.f32.xlu0 %v126_v35  ;;  %v137_v37 = vadd.f32 %v136_v36, %v2064_v33 }
  0x71   :  { %138 = vadd.xlane.f32.xlu0 %v137_v37 }
  0xfa   :  { %v128_v44 = vpop.xlane.xlu0 %127 }
  0xfb   :  { %v141_v45 = vmul.f32 0.00078125, %v128_v44  ;;  %v1678_v44 = vld [vmem:[#allocation8 + $0x88] sm:$0xff]  }
  0xfc   :  { %1543 = vmatpush3.bf16.msra.mxu1 %v1678_v44 }
  0xfd   :  { %v2069_v46 = vsub.f32 %v98_v0, %v141_v45  ;;  %v2071_v47 = vsub.f32 %v99_v1, %v141_v45  ;;  %v2073_v49 = vsub.f32 %v100_v2, %v141_v45  ;;  %v2077_v52 = vsub.f32 %v101_v4, %v141_v45 }
  0xfe   :  { %v139_v48 = vpop.xlane.xlu0 %138  ;;  %v2081_v54 = vsub.f32 %v102_v8, %v141_v45  ;;  %v2089_v59 = vsub.f32 %v103_v11, %v141_v45  ;;  %v2095_v63 = vsub.f32 %v104_v14, %v141_v45  ;;  %v2106_v5 = vsub.f32 %v105_v19, %v141_v45 }
  0xff   :  { %v142_v50 = vmul.f32 0.00078125, %v139_v48  ;;  %v163_v51 = vmul.f32 %v2069_v46, %v2069_v46  ;;  %v164_v53 = vmul.f32 %v2071_v47, %v2071_v47  ;;  %v165_v55 = vmul.f32 %v2073_v49, %v2073_v49  ;;  %v1681_v48 = vld [vmem:[#allocation8 + $0x10] sm:$0xff]  }
 0x100   :  { %v166_v60 = vmul.f32 %v2077_v52, %v2077_v52  ;;  %v167_v2 = vmul.f32 %v2081_v54, %v2081_v54  ;;  %v2115_v11 = vsub.f32 %v106_v23, %v141_v45  ;;  %v169_v12 = vmul.f32 %v2095_v63, %v2095_v63 }
 0x101   :  { %v183_v56 = vadd.f32 %v164_v53, %v163_v51  ;;  %v2085_v57 = vsub.f32 %v108_v6, %v142_v50  ;;  %v2087_v58 = vsub.f32 %v109_v7, %v142_v50  ;;  %v2093_v62 = vsub.f32 %v110_v9, %v142_v50  ;;  %v1683_v51 = vld [vmem:[#allocation8 + $0x58] sm:$0xff]  }
 0x102   :  { %v2104_v4 = vsub.f32 %v2048_v13, %v142_v50  ;;  %v168_v6 = vmul.f32 %v2089_v59, %v2089_v59  ;;  %v2111_v8 = vsub.f32 %v2050_v15, %v142_v50  ;;  %v2120_v14 = vsub.f32 %v2052_v18, %v142_v50  ;;  %v1684_v53 = vld [vmem:[#allocation8 + $0xd8] sm:$0xff]  }
 0x103   :  { %v184_v61 = vadd.f32 %v183_v56, %v165_v55  ;;  %v173_v0 = vmul.f32 %v2085_v57, %v2085_v57  ;;  %v174_v1 = vmul.f32 %v2087_v58, %v2087_v58  ;;  %v175_v9 = vmul.f32 %v2093_v62, %v2093_v62  ;;  %v1685_v55 = vld [vmem:[#allocation8 + $0x18] sm:$0xff]  }
 0x104   :  { %v176_v16 = vmul.f32 %v2104_v4, %v2104_v4  ;;  %v2124_v19 = vsub.f32 %v107_v27, %v141_v45  ;;  %v170_v15 = vmul.f32 %v2106_v5, %v2106_v5  ;;  %v2129_v21 = vsub.f32 %v2055_v22, %v142_v50  ;;  %v1680_v45 = vld [vmem:[#allocation8 + $0xd0] sm:$0xff]   ;;  %v1686_v56 = vld [vmem:[#allocation8 + $0x98] sm:$0xff]  }
 0x105   :  { %v185_v3 = vadd.f32 %v184_v61, %v166_v60  ;;  %v194_v10 = vadd.f32 %v174_v1, %v173_v0  ;;  %v177_v23 = vmul.f32 %v2111_v8, %v2111_v8  ;;  %v171_v18 = vmul.f32 %v2115_v11, %v2115_v11  ;;  %1544 = vmatprep.subr.bf16.mxu1 %v1680_v45  ;;  %v1687_v60 = vld [vmem:[#allocation8 + $0x60] sm:$0xff]  }
 0x106   :  { %v2136_v28 = vsub.f32 %v2058_v26, %v142_v50  ;;  %v178_v27 = vmul.f32 %v2120_v14, %v2120_v14  ;;  %v172_v31 = vmul.f32 %v2124_v19, %v2124_v19  ;;  %v2143_v32 = vsub.f32 %v2061_v30, %v142_v50  ;;  %v1688_v61 = vld [vmem:[#allocation8 + $0xe0] sm:$0xff]  }
 0x107   :  { %v186_v7 = vadd.f32 %v185_v3, %v167_v2  ;;  %v195_v17 = vadd.f32 %v194_v10, %v175_v9  ;;  %v179_v34 = vmul.f32 %v2129_v21, %v2129_v21  ;;  %v2148_v37 = vsub.f32 %v2064_v33, %v142_v50  ;;  %v1679_v33 = vld [vmem:[#allocation8 + $0x50] sm:$0xff]   ;;  %v1689_v0 = vld [vmem:[#allocation8 + $0x20] sm:$0xff]   ;;  %v1691_v2 = vld [vmem:[#allocation8 + $0x68] sm:$0xff]  }
 0x108   :  { %v180_v26 = vmul.f32 %v2136_v28, %v2136_v28  ;;  %v181_v39 = vmul.f32 %v2143_v32, %v2143_v32  ;;  %v1682_v50 = vld [vmem:[#allocation8 + $0x90] sm:$0xff]   ;;  %1522 = vmatprep.subr.bf16.mxu0 %v1679_v33  ;;  %v1690_v1 = vld [vmem:[#allocation8 + $0xa0] sm:$0xff]   ;;  %v1692_v3 = vld [vmem:[#allocation8 + $0xe8] sm:$0xff]  }
 0x109   :  { %v187_v13 = vadd.f32 %v186_v7, %v168_v6  ;;  %v196_v24 = vadd.f32 %v195_v17, %v176_v16  ;;  %v182_v30 = vmul.f32 %v2148_v37, %v2148_v37  ;;  %1523 = vmatpush3.bf16.msra.mxu0 %v1681_v48  ;;  %1545 = vmatpush3.bf16.msra.mxu1 %v1682_v50  ;;  %v1693_v6 = vld [vmem:[#allocation8 + $0x28] sm:$0xff]   ;;  %v1695_v9 = vld [vmem:[#allocation8 + $0x70] sm:$0xff]   ;;  %v1699_v16 = vld [vmem:[#allocation8 + $0x78] sm:$0xff]  }
 0x10a   :  { %1524 = vmatprep.subr.bf16.mxu0 %v1683_v51  ;;  %1546 = vmatprep.subr.bf16.mxu1 %v1684_v53  ;;  %v1694_v7 = vld [vmem:[#allocation8 + $0xa8] sm:$0xff]   ;;  %v1696_v10 = vld [vmem:[#allocation8 + $0xf0] sm:$0xff]   ;;  %v1700_v17 = vld [vmem:[#allocation8 + $0xf8] sm:$0xff]  }
 0x10b   :  { %v188_v20 = vadd.f32 %v187_v13, %v169_v12  ;;  %v197_v29 = vadd.f32 %v196_v24, %v177_v23  ;;  %v1697_v12 = vld [vmem:[#allocation8 + $0x30] sm:$0xff]   ;;  %v1703_v23 = vld [vmem:[#allocation8 + $0x140] sm:$0xff]  }
 0x10c   :  { %v1698_v13 = vld [vmem:[#allocation8 + $0xb0] sm:$0xff]   ;;  %v1704_v24 = vld [vmem:[#allocation8 + $0x1c0] sm:$0xff]  }
 0x10d   :  { %v189_v25 = vadd.f32 %v188_v20, %v170_v15  ;;  %v198_v35 = vadd.f32 %v197_v29, %v178_v27  ;;  %1525 = vmatpush3.bf16.msra.mxu0 %v1685_v55  ;;  %1547 = vmatpush3.bf16.msra.mxu1 %v1686_v56  ;;  %v1701_v15 = vld [vmem:[#allocation8 + $0x38] sm:$0xff]   ;;  %v235_v27 = vlaneseq }
 0x10e   :  { %1526 = vmatprep.subr.bf16.mxu0 %v1687_v60  ;;  %1548 = vmatprep.subr.bf16.mxu1 %v1688_v61  ;;  %v1702_v20 = vld [vmem:[#allocation8 + $0xb8] sm:$0xff]  }
 0x10f   :  { %v190_v22 = vadd.f32 %v189_v25, %v171_v18  ;;  %v199_v38 = vadd.f32 %v198_v35, %v179_v34  ;;  %v2180_v50 = vld [vmem:[#allocation7] sm:$0xff] }
 0x111   :  { %v191_v36 = vadd.f32 %v190_v22, %v172_v31  ;;  %v200_v40 = vadd.f32 %v199_v38, %v180_v26  ;;  %1527 = vmatpush3.bf16.msra.mxu0 %v1689_v0  ;;  %1549 = vmatpush3.bf16.msra.mxu1 %v1690_v1  ;;  %v2156_v22 = vshrl.u32 %v235_v27, 7 }
 0x112   :  { %1528 = vmatprep.subr.bf16.mxu0 %v1691_v2  ;;  %1550 = vmatprep.subr.bf16.mxu1 %v1692_v3 }
 0x113   :  { %192 = vadd.xlane.f32.xlu1 %v191_v36  ;;  %v201_v41 = vadd.f32 %v200_v40, %v181_v39  ;;  %v2159_v36 = vsub.s32 1, %v2156_v22  ;;  %v249_v26 = vsub.s32 3, %v2156_v22  ;;  %v2163_v38 = vsub.s32 0, %v2156_v22  ;;  %v2166_v40 = vld [vmem:[#allocation5] sm:$0xff] }
 0x114   :  { %v245_v39 = vsub.s32 2, %v2156_v22 }
 0x115   :  { %v202_v42 = vadd.f32 %v201_v41, %v182_v30  ;;  %1529 = vmatpush3.bf16.msra.mxu0 %v1693_v6  ;;  %1551 = vmatpush3.bf16.msra.mxu1 %v1694_v7  ;;  %v257_v30 = vsub.s32 5, %v2156_v22  ;;  %v265_v41 = vsub.s32 7, %v2156_v22  ;;  %v242_v43 = vrot.slane %v2166_v40, %v2159_v36 }
 0x116   :  { %1530 = vmatprep.subr.bf16.mxu0 %v1695_v9  ;;  %1552 = vmatprep.subr.bf16.mxu1 %v1696_v10  ;;  %v250_v44 = vrot.slane %v2166_v40, %v249_v26  ;;  %v238_v33 = vrot.slane %v2166_v40, %v2163_v38  ;;  %v246_v45 = vrot.slane %v2166_v40, %v245_v39 }
 0x117   :  { %203 = vadd.xlane.f32.xlu1 %v202_v42  ;;  %v258_v53 = vrot.slane %v2166_v40, %v257_v30  ;;  %v266_v55 = vrot.slane %v2166_v40, %v265_v41  ;;  %v324_v2 = vrot.slane %v2180_v50, %v249_v26  ;;  %v312_v3 = vrot.slane %v2180_v50, %v2163_v38 }
 0x118   :  { %v340_v6 = vrot.slane %v2180_v50, %v265_v41 }
 0x119   :  { %1531 = vmatpush3.bf16.msra.mxu0 %v1697_v12  ;;  %1553 = vmatpush3.bf16.msra.mxu1 %v1698_v13 }
 0x11a   :  { %1532 = vmatprep.subr.bf16.mxu0 %v1699_v16  ;;  %1554 = vmatprep.subr.bf16.mxu1 %v1700_v17 }
 0x11d   :  { %1533 = vmatpush3.bf16.msra.mxu0 %v1701_v15  ;;  %1555 = vmatpush3.bf16.msra.mxu1 %v1702_v20 }
 0x11e   :  { %1562 = vmatprep.subr.bf16.mxu0 %v1703_v23  ;;  %1584 = vmatprep.subr.bf16.mxu1 %v1704_v24 }
 0x1a0   :  { %v193_v18 = vpop.xlane.xlu1 %192 }
 0x1a1   :  { %v205_v25 = vmul.f32 0.00078125, %v193_v18 }
 0x1a3   :  { %v207_v29 = vadd.f32 1e-05, %v205_v25 }
 0x1a4   :  { %v204_v31 = vpop.xlane.xlu1 %203 }
 0x1a5   :  { %1759 = vrsqrt.f32 %v207_v29  ;;  %v206_v34 = vmul.f32 0.00078125, %v204_v31  ;;  %v2216_v29 = vld [vmem:[#allocation5 + $0x8] sm:$0x3] }
 0x1a7   :  { %v208_v35 = vadd.f32 1e-05, %v206_v34 }
 0x1a9   :  { %1761 = vrsqrt.f32 %v208_v35 }
 0x1af   :  { %v2170_v42 = vpop.eup %1759 }
 0x1b0   :  { %v212_v48 = vmul.f32 %v2170_v42, %v2071_v47  ;;  %v214_v51 = vmul.f32 %v2170_v42, %v2077_v52  ;;  %v211_v56 = vmul.f32 %v2170_v42, %v2069_v46  ;;  %v213_v60 = vmul.f32 %v2170_v42, %v2073_v49 }
 0x1b1   :  { %v216_v61 = vmul.f32 %v2170_v42, %v2089_v59  ;;  %v218_v47 = vmul.f32 %v2170_v42, %v2106_v5  ;;  %v316_v52 = vrot.slane %v2180_v50, %v2159_v36  ;;  %v320_v46 = vrot.slane %v2180_v50, %v245_v39 }
 0x1b2   :  { %v286_v0 = vmul.f32 %v242_v43, %v212_v48  ;;  %v288_v1 = vmul.f32 %v250_v44, %v214_v51  ;;  %v332_v49 = vrot.slane %v2180_v50, %v257_v30  ;;  %v285_v7 = vmul.f32 %v238_v33, %v211_v56  ;;  %v1705_v48 = vld [vmem:[#allocation8 + $0x100] sm:$0xff]  }
 0x1b3   :  { %v2202_v59 = vpop.eup %1761  ;;  %v287_v5 = vmul.f32 %v246_v45, %v213_v60  ;;  %v290_v9 = vmul.f32 %v258_v53, %v216_v61  ;;  %v292_v10 = vmul.f32 %v266_v55, %v218_v47  ;;  %v1706_v51 = vld [vmem:[#allocation8 + $0x180] sm:$0xff]   ;;  %v1708_v60 = vld [vmem:[#allocation8 + $0x1c8] sm:$0xff]   ;;  %v219_v47 = vmul.f32 %v2170_v42, %v2115_v11 }
 0x1b4   :  { %v222_v12 = vmul.f32 %v2202_v59, %v2087_v58  ;;  %v224_v13 = vmul.f32 %v2202_v59, %v2104_v4  ;;  %v221_v16 = vmul.f32 %v2202_v59, %v2085_v57  ;;  %v223_v17 = vmul.f32 %v2202_v59, %v2093_v62 }
 0x1b5   :  { %v360_v15 = vadd.f32 %v316_v52, %v286_v0  ;;  %v362_v20 = vadd.f32 %v324_v2, %v288_v1  ;;  %v226_v23 = vmul.f32 %v2202_v59, %v2120_v14  ;;  %v228_v24 = vmul.f32 %v2202_v59, %v2136_v28  ;;  %v2220_v28 = vld [vmem:[#allocation7 + $0x8] sm:$0x3] }
 0x1b6   :  { %v296_v18 = vmul.f32 %v242_v43, %v222_v12  ;;  %v298_v25 = vmul.f32 %v250_v44, %v224_v13  ;;  %v295_v58 = vmul.f32 %v238_v33, %v221_v16  ;;  %v297_v27 = vmul.f32 %v246_v45, %v223_v17  ;;  %v1717_v13 = vld [vmem:[#allocation8 + $0x118] sm:$0xff]   ;;  %v1719_v17 = vld [vmem:[#allocation8 + $0x160] sm:$0xff]  }
 0x1b7   :  { %v359_v4 = vadd.f32 %v312_v3, %v285_v7  ;;  %v361_v31 = vadd.f32 %v320_v46, %v287_v5  ;;  %v300_v57 = vmul.f32 %v258_v53, %v226_v23  ;;  %v302_v34 = vmul.f32 %v266_v55, %v228_v24  ;;  %v1707_v55 = vld [vmem:[#allocation8 + $0x148] sm:$0xff]   ;;  %v1713_v5 = vld [vmem:[#allocation8 + $0x110] sm:$0xff]   ;;  %v1718_v16 = vld [vmem:[#allocation8 + $0x198] sm:$0xff]  }
 0x1b8   :  { %v370_v35 = vadd.f32 %v316_v52, %v296_v18  ;;  %v372_v62 = vadd.f32 %v324_v2, %v298_v25  ;;  %v369_v26 = vadd.f32 %v312_v3, %v295_v58  ;;  %v371_v39 = vadd.f32 %v320_v46, %v297_v27  ;;  %v1709_v2 = vld [vmem:[#allocation8 + $0x108] sm:$0xff]   ;;  %v1722_v23 = vld [vmem:[#allocation8 + $0x1a0] sm:$0xff]  }
 0x1b9   :  { %v374_v30 = vadd.f32 %v332_v49, %v300_v57  ;;  %v376_v41 = vadd.f32 %v340_v6, %v302_v34  ;;  %v270_v14 = vrot.slane %v2216_v29, %v2163_v38  ;;  %v364_v56 = vadd.f32 %v332_v49, %v290_v9  ;;  %v1710_v3 = vld [vmem:[#allocation8 + $0x188] sm:$0xff]   ;;  %v1711_v49 = vld [vmem:[#allocation8 + $0x150] sm:$0xff]   ;;  %v1715_v9 = vld [vmem:[#allocation8 + $0x158] sm:$0xff]  }
 0x1ba   :  { %v380_v43 = vpack.c.bf16 %v370_v35, %v360_v15  ;;  %v382_v44 = vpack.c.bf16 %v372_v62, %v362_v20  ;;  %v379_v33 = vpack.c.bf16 %v369_v26, %v359_v4  ;;  %v381_v45 = vpack.c.bf16 %v371_v39, %v361_v31  ;;  %v1720_v15 = vld [vmem:[#allocation8 + $0x1e0] sm:$0xff]   ;;  %v1723_v24 = vld [vmem:[#allocation8 + $0x168] sm:$0xff]   ;;  %v1727_v31 = vld [vmem:[#allocation8 + $0x170] sm:$0xff]  }
 0x1bb   :  { %v366_v53 = vadd.f32 %v340_v6, %v292_v10  ;;  %v344_v61 = vrot.slane %v2220_v28, %v2163_v38  ;;  %v384_v0 = vpack.c.bf16 %v374_v30, %v364_v56  ;;  %v229_v1 = vmul.f32 %v2202_v59, %v2143_v32  ;;  %v1712_v6 = vld [vmem:[#allocation8 + $0x1d0] sm:$0xff]   ;;  %v1716_v10 = vld [vmem:[#allocation8 + $0x1d8] sm:$0xff]   ;;  %v1721_v20 = vld [vmem:[#allocation8 + $0x120] sm:$0xff]  }
 0x1bc   :  { %1068 = vmatprep.mubr.bf16.mxu0 %v380_v43  ;;  %1109 = vmatprep.mubr.bf16.mxu1 %v382_v44  ;;  %v293_v46 = vmul.f32 %v270_v14, %v219_v47  ;;  %v1714_v32 = vld [vmem:[#allocation8 + $0x190] sm:$0xff]   ;;  %v1724_v18 = vld [vmem:[#allocation8 + $0x1e8] sm:$0xff]   ;;  %v253_v25 = vsub.s32 4, %v2156_v22  ;;  %v261_v58 = vsub.s32 6, %v2156_v22  ;;  %v225_v34 = vmul.f32 %v2202_v59, %v2111_v8  ;;  %v1736_v47 = vld [vmem:[#allocation8 + $0x200] sm:$0xff]  }
 0x1bd   :  { %1069 = vmatmul.mubr.bf16.vlgmr.msra.gmra.mrb[0].mxu0 %v379_v33  ;;  %1110 = vmatmul.mubr.bf16.vlgmr.msra.gmra.mrb[0].mxu1 %v381_v45  ;;  %v386_v52 = vpack.c.bf16 %v376_v41, %v366_v53  ;;  %v303_v38 = vmul.f32 %v270_v14, %v229_v1  ;;  %v1725_v27 = vld [vmem:[#allocation8 + $0x128] sm:$0xff]   ;;  %v1728_v57 = vld [vmem:[#allocation8 + $0x1f0] sm:$0xff]   ;;  %v227_v35 = vmul.f32 %v2202_v59, %v2129_v21  ;;  %v1735_v53 = vld [vmem:[#allocation8 + $0x240] sm:$0xff]  }
 0x1be   :  { %1563 = vmatpush3.bf16.msra.mxu0 %v1705_v48  ;;  %1585 = vmatpush3.bf16.msra.mxu1 %v1706_v51  ;;  %v2228_v11 = vadd.f32 %v344_v61, %v293_v46  ;;  %v1726_v4 = vld [vmem:[#allocation8 + $0x1a8] sm:$0xff]   ;;  %v230_v62 = vmul.f32 %v2202_v59, %v2148_v37  ;;  %v215_v22 = vmul.f32 %v2170_v42, %v2081_v54  ;;  %v1729_v41 = vld [vmem:[#allocation8 + $0x130] sm:$0xff]   ;;  %v1731_v54 = vld [vmem:[#allocation8 + $0x178] sm:$0xff]  }
 0x1bf   :  { %1150 = vmatprep.mubr.bf16.mxu0 %v384_v0  ;;  %1191 = vmatprep.mubr.bf16.mxu1 %v386_v52  ;;  %v2230_v7 = vadd.f32 %v344_v61, %v303_v38  ;;  %v254_v26 = vrot.slane %v2166_v40, %v253_v25  ;;  %v217_v39 = vmul.f32 %v2170_v42, %v2095_v63  ;;  %v1730_v8 = vld [vmem:[#allocation8 + $0x1b0] sm:$0xff]   ;;  %v1732_v59 = vld [vmem:[#allocation8 + $0x1f8] sm:$0xff]   ;;  %v1737_v1 = vld [vmem:[#allocation8 + $0x248] sm:$0xff]  }
 0x1c0   :  { %1564 = vmatprep.subr.bf16.mxu0 %v1707_v55  ;;  %1586 = vmatprep.subr.bf16.mxu1 %v1708_v60  ;;  %v262_v30 = vrot.slane %v2166_v40, %v261_v58  ;;  %v220_v21 = vmul.f32 %v2170_v42, %v2124_v19  ;;  %v274_v37 = vrot.slane %v2216_v29, %v2159_v36  ;;  %v1733_v48 = vld [vmem:[#allocation8 + $0x138] sm:$0xff]   ;;  %v1744_v38 = vld [vmem:[#allocation8 + $0x220] sm:$0xff]  }
 0x1c1   :  { %v387_v12 = vpack.c.bf16 %v2230_v7, %v2228_v11  ;;  %v299_v14 = vmul.f32 %v254_v26, %v225_v34  ;;  %v289_v63 = vmul.f32 %v254_v26, %v215_v22  ;;  %v328_v40 = vrot.slane %v2180_v50, %v253_v25  ;;  %v1734_v19 = vld [vmem:[#allocation8 + $0x1b8] sm:$0xff]   ;;  %v1756_v25 = vld [vmem:[#allocation10 + $0x28] sm:$0xff]   ;;  %v1757_v11 = vld [vmem:[#allocation10 + $0x30] sm:$0xff]  }
 0x1c2   :  { %1565 = vmatpush3.bf16.msra.mxu0 %v1709_v2  ;;  %1587 = vmatpush3.bf16.msra.mxu1 %v1710_v3  ;;  %v301_v43 = vmul.f32 %v262_v30, %v227_v35  ;;  %v304_v44 = vmul.f32 %v274_v37, %v230_v62  ;;  %v291_v33 = vmul.f32 %v262_v30, %v217_v39  ;;  %v1740_v3 = vld [vmem:[#allocation8 + $0x210] sm:$0xff]   ;;  %v1741_v46 = vld [vmem:[#allocation8 + $0x258] sm:$0xff]  }
 0x1c3   :  { %1566 = vmatprep.subr.bf16.mxu0 %v1711_v49  ;;  %1588 = vmatprep.subr.bf16.mxu1 %v1712_v6  ;;  %v336_v45 = vrot.slane %v2180_v50, %v261_v58  ;;  %v294_v42 = vmul.f32 %v274_v37, %v220_v21  ;;  %v348_v29 = vrot.slane %v2220_v28, %v2159_v36  ;;  %v1738_v36 = vld [vmem:[#allocation8 + $0x208] sm:$0xff]   ;;  %v1739_v28 = vld [vmem:[#allocation8 + $0x250] sm:$0xff]   ;;  %v1742_v49 = vld [vmem:[#allocation8 + $0x218] sm:$0xff]  }
 0x1c4   :  { %v373_v51 = vadd.f32 %v328_v40, %v299_v14  ;;  %v363_v60 = vadd.f32 %v328_v40, %v289_v63  ;;  %v1743_v6 = vld [vmem:[#allocation8 + $0x260] sm:$0xff]   ;;  %v1758_v7 = vld [vmem:[#allocation10 + $0x38] sm:$0xff]  }
 0x1c5   :  { %v375_v56 = vadd.f32 %v336_v45, %v301_v43  ;;  %v378_v55 = vadd.f32 %v348_v29, %v304_v44  ;;  %v365_v61 = vadd.f32 %v336_v45, %v291_v33  ;;  %v368_v50 = vadd.f32 %v348_v29, %v294_v42 }
 0x1c6   :  { %1567 = vmatpush3.bf16.msra.mxu0 %v1713_v5  ;;  %1589 = vmatpush3.bf16.msra.mxu1 %v1714_v32  ;;  %v383_v0 = vpack.c.bf16 %v373_v51, %v363_v60  ;;  %v1745_v5 = vld [vmem:[#allocation8 + $0x268] sm:$0xff]  }
 0x1c7   :  { %1568 = vmatprep.subr.bf16.mxu0 %v1715_v9  ;;  %1590 = vmatprep.subr.bf16.mxu1 %v1716_v10  ;;  %v385_v52 = vpack.c.bf16 %v375_v56, %v365_v61  ;;  %v388_v2 = vpack.c.bf16 %v378_v55, %v368_v50  ;;  %v1746_v32 = vld [vmem:[#allocation8 + $0x228] sm:$0xff]   ;;  %v1747_v9 = vld [vmem:[#allocation8 + $0x270] sm:$0xff]  }
 0x1c8   :  { %v1748_v10 = vld [vmem:[#allocation8 + $0x230] sm:$0xff]  }
 0x1ca   :  { %1569 = vmatpush3.bf16.msra.mxu0 %v1717_v13  ;;  %1591 = vmatpush3.bf16.msra.mxu1 %v1718_v16  ;;  %v1749_v13 = vld [vmem:[#allocation8 + $0x278] sm:$0xff]  }
 0x1cb   :  { %1570 = vmatprep.subr.bf16.mxu0 %v1719_v17  ;;  %1592 = vmatprep.subr.bf16.mxu1 %v1720_v15  ;;  %v1750_v16 = vld [vmem:[#allocation8 + $0x238] sm:$0xff]   ;;  %v1751_v17 = vld [vmem:[#allocation10] sm:$0xff]   ;;  %v1920_v15 = vmov 0.0  }
 0x1ce   :  { %1571 = vmatpush3.bf16.msra.mxu0 %v1721_v20  ;;  %1593 = vmatpush3.bf16.msra.mxu1 %v1722_v23  ;;  %v1752_v20 = vld [vmem:[#allocation10 + $0x8] sm:$0xff]   ;;  %v1753_v23 = vld [vmem:[#allocation10 + $0x10] sm:$0xff]  }
 0x1cf   :  { %1572 = vmatprep.subr.bf16.mxu0 %v1723_v24  ;;  %1594 = vmatprep.subr.bf16.mxu1 %v1724_v18  ;;  %v1754_v24 = vld [vmem:[#allocation10 + $0x18] sm:$0xff]   ;;  %v1755_v18 = vld [vmem:[#allocation10 + $0x20] sm:$0xff]  }
 0x1d2   :  { %1573 = vmatpush3.bf16.msra.mxu0 %v1725_v27  ;;  %1595 = vmatpush3.bf16.msra.mxu1 %v1726_v4  ;;  %v1426_v27 = vld [vmem:[%s2287_s4] ss:$0 sm:$0xff] }
 0x1d3   :  { %1574 = vmatprep.subr.bf16.mxu0 %v1727_v31  ;;  %1596 = vmatprep.subr.bf16.mxu1 %v1728_v57 }
 0x1d6   :  { %1575 = vmatpush3.bf16.msra.mxu0 %v1729_v41  ;;  %1597 = vmatpush3.bf16.msra.mxu1 %v1730_v8 }
 0x1d7   :  { %1576 = vmatprep.subr.bf16.mxu0 %v1731_v54  ;;  %1598 = vmatprep.subr.bf16.mxu1 %v1732_v59 }
 0x1da   :  { %1577 = vmatpush3.bf16.msra.mxu0 %v1733_v48  ;;  %1599 = vmatpush3.bf16.msra.mxu1 %v1734_v19 }
 0x1db   :  { %1606 = vmatprep.subr.bf16.mxu0 %v1735_v53  ;;  %1637 = vmatprep.subr.bf16.mxu1 %v1920_v15 }
 0x1dd   :  { %1151 = vmatmul.mubr.bf16.vlgmr.msra.gmra.mrb[4].mxu0 %v383_v0  ;;  %1192 = vmatmul.mubr.bf16.vlgmr.msra.gmra.mrb[4].mxu1 %v385_v52 }
 0x1de   :  { %1607 = vmatpush3.bf16.msra.mxu0 %v1736_v47  ;;  %1232 = vmatprep.mubr.bf16.mxu0 %v388_v2 }
 0x1df   :  { %1608 = vmatprep.subr.bf16.mxu0 %v1737_v1  ;;  %1638 = vmatpush3.bf16.msra.mxu1 %v1751_v17 }
 0x1e0   :  { %1639 = vmatprep.subr.bf16.mxu1 %v1920_v15  ;;  %1653 = vmatprep.mubr.msk.bf16.mxu1 %vm1921_vm0, %v1920_v15 }
 0x1e2   :  { %1609 = vmatpush3.bf16.msra.mxu0 %v1738_v36 }
 0x1e3   :  { %1610 = vmatprep.subr.bf16.mxu0 %v1739_v28  ;;  %1640 = vmatpush3.bf16.msra.mxu1 %v1752_v20 }
 0x1e4   :  { %1641 = vmatprep.subr.bf16.mxu1 %v1920_v15 }
 0x1e6   :  { %1611 = vmatpush3.bf16.msra.mxu0 %v1740_v3 }
 0x1e7   :  { %1612 = vmatprep.subr.bf16.mxu0 %v1741_v46  ;;  %1642 = vmatpush3.bf16.msra.mxu1 %v1753_v23 }
 0x1e8   :  { %1643 = vmatprep.subr.bf16.mxu1 %v1920_v15 }
 0x1ea   :  { %1613 = vmatpush3.bf16.msra.mxu0 %v1742_v49 }
 0x1eb   :  { %1614 = vmatprep.subr.bf16.mxu0 %v1743_v6  ;;  %1644 = vmatpush3.bf16.msra.mxu1 %v1754_v24 }
 0x1ec   :  { %1645 = vmatprep.subr.bf16.mxu1 %v1920_v15 }
 0x1ee   :  { %1615 = vmatpush3.bf16.msra.mxu0 %v1744_v38 }
 0x1ef   :  { %1616 = vmatprep.subr.bf16.mxu0 %v1745_v5  ;;  %1646 = vmatpush3.bf16.msra.mxu1 %v1755_v18 }
 0x1f0   :  { %1647 = vmatprep.subr.bf16.mxu1 %v1920_v15 }
 0x1f2   :  { %1617 = vmatpush3.bf16.msra.mxu0 %v1746_v32 }
 0x1f3   :  { %1618 = vmatprep.subr.bf16.mxu0 %v1747_v9  ;;  %1648 = vmatpush3.bf16.msra.mxu1 %v1756_v25 }
 0x1f4   :  { %1649 = vmatprep.subr.bf16.mxu1 %v1920_v15 }
 0x1f6   :  { %1619 = vmatpush3.bf16.msra.mxu0 %v1748_v10  ;;  %v1507_v10 = vld [vmem:[%s2289_s6] ss:$0 sm:$0xff] }
 0x1f7   :  { %1620 = vmatprep.subr.bf16.mxu0 %v1749_v13  ;;  %1650 = vmatpush3.bf16.msra.mxu1 %v1757_v11 }
 0x1f8   :  { %1651 = vmatprep.subr.bf16.mxu1 %v1920_v15 }
 0x1fa   :  { %1621 = vmatpush3.bf16.msra.mxu0 %v1750_v16 }
 0x1fb   :  { %1652 = vmatpush3.bf16.msra.mxu1 %v1758_v7 }
 0x1fd   :  { %1233 = vmatmul.mubr.bf16.vlgmr.msra.gmra.mrb[8].mxu0 %v387_v12 }
 0x290   :  { %v1534_v12 = vpop.f32.mrb[0].mxu0  ;;  %v1556_v58 = vpop.f32.mrb[0].mxu1 }
 0x291   :  { %v1535_v4 = vpop.f32.mrb[1].mxu0  ;;  %v1557_v31 = vpop.f32.mrb[1].mxu1 }
 0x292   :  { %v1536_v57 = vadd.f32 %v1535_v4, %v1534_v12  ;;  %v1558_v34 = vadd.f32 %v1557_v31, %v1556_v58  ;;  %v1537_v35 = vpop.f32.mrb[2].mxu0  ;;  %v1559_v62 = vpop.f32.mrb[2].mxu1 }
 0x293   :  { %v1538_v22 = vpop.f32.mrb[3].mxu0  ;;  %v1560_v26 = vpop.f32.mrb[3].mxu1 }
 0x294   :  { %v1071_v39 = vadd.f32 %v1536_v57, %v1426_v27  ;;  %v1539_v30 = vadd.f32 %v1538_v22, %v1537_v35  ;;  %v1561_v41 = vadd.f32 %v1560_v26, %v1559_v62  ;;  %v1516_v26 = vld [vmem:[%s2290_s7] ss:$0 sm:$0xff] }
 0x296   :  { %v1112_v8 = vadd.f32 %v1558_v34, %v1071_v39  ;;  %v1074_v21 = vadd.f32 %v1539_v30, %v1426_v27 }
 0x298   :  { %v1115_v37 = vadd.f32 %v1561_v41, %v1074_v21  ;;  %v1517_v41 = vld [vmem:[%s2291_s8] ss:$0 sm:$0xff] }
 0x2b0   :  { %v1578_v54 = vpop.f32.mrb[4].mxu0  ;;  %v1600_v59 = vpop.f32.mrb[4].mxu1 }
 0x2b1   :  { %v1579_v14 = vpop.f32.mrb[5].mxu0  ;;  %v1601_v43 = vpop.f32.mrb[5].mxu1 }
 0x2b2   :  { %v1580_v44 = vadd.f32 %v1579_v14, %v1578_v54  ;;  %v1602_v63 = vadd.f32 %v1601_v43, %v1600_v59  ;;  %v1581_v40 = vpop.f32.mrb[6].mxu0  ;;  %v1603_v33 = vpop.f32.mrb[6].mxu1 }
 0x2b3   :  { %v1582_v45 = vpop.f32.mrb[7].mxu0  ;;  %v1604_v48 = vpop.f32.mrb[7].mxu1 }
 0x2b4   :  { %v1153_v19 = vadd.f32 %v1580_v44, %v1112_v8  ;;  %v1583_v42 = vadd.f32 %v1582_v45, %v1581_v40  ;;  %v1605_v29 = vadd.f32 %v1604_v48, %v1603_v33 }
 0x2b6   :  { %v1194_v51 = vadd.f32 %v1602_v63, %v1153_v19  ;;  %v1156_v56 = vadd.f32 %v1583_v42, %v1115_v37 }
 0x2b8   :  { %v1197_v53 = vadd.f32 %v1605_v29, %v1156_v56 }
 0x2d0   :  { %v1622_v55 = vpop.f32.mrb[8].mxu0 }
 0x2d1   :  { %v1623_v60 = vpop.f32.mrb[9].mxu0 }
 0x2d2   :  { %v1624_v61 = vadd.f32 %v1623_v60, %v1622_v55  ;;  %v1625_v47 = vpop.f32.mrb[10].mxu0 }
 0x2d3   :  { %v1626_v50 = vpop.f32.mrb[11].mxu0 }
 0x2d4   :  { %v1235_v0 = vadd.f32 %v1624_v61, %v1194_v51  ;;  %v1627_v52 = vadd.f32 %v1626_v50, %v1625_v47 }
 0x2d6   :  { %v1243_v1 = vmul.f32 0.70710677, %v1235_v0  ;;  %v1238_v2 = vadd.f32 %v1627_v52, %v1197_v53  ;;  %v1241_v49 = vmul.f32 0.5, %v1235_v0 }
 0x2d8   :  { %1763 = verf.f32 %v1243_v1  ;;  %v1244_v36 = vmul.f32 0.70710677, %v1238_v2  ;;  %v1242_v6 = vmul.f32 0.5, %v1238_v2 }
 0x2da   :  { %1765 = verf.f32 %v1244_v36 }
 0x2e2   :  { %v1764_v28 = vpop.eup %1763 }
 0x2e3   :  { %v1247_v3 = vadd.f32 1.0, %v1764_v28 }
 0x2e4   :  { %v1766_v46 = vpop.eup %1765 }
 0x2e5   :  { %v1248_v38 = vadd.f32 1.0, %v1766_v46  ;;  %v1249_v5 = vmul.f32 %v1247_v3, %v1241_v49 }
 0x2e7   :  { %v1250_v32 = vmul.f32 %v1248_v38, %v1242_v6 }
 0x2e9   :  { %v1251_v9 = vpack.c.bf16 %v1250_v32, %v1249_v5 }
 0x2eb   :  { %1654 = vmatmul.mubr.bf16.vlgmr.msra.gmra.mrb[8].mxu1 %v1251_v9 }
 0x3be   :  { %v1357_v13 = vpop.f32.mrb[8].mxu1 }
 0x3bf   :  { %v1358_v16 = vadd.f32 %v1507_v10, %v1357_v13  ;;  %v1655_v17 = vpop.f32.mrb[9].mxu1 }
 0x3c0   :  { %v1360_v15 = vpop.f32.mrb[10].mxu1 }
 0x3c1   :  { %v1361_v20 = vadd.f32 %v1507_v10, %v1360_v15  ;;  %1364 = vadd.xlane.f32.xlu0 %v1358_v16  ;;  %v1656_v23 = vpop.f32.mrb[11].mxu1 }
 0x3c3   :  { %1366 = vadd.xlane.f32.xlu1 %v1361_v20 }
 0x44e   :  { %v1365_v24 = vpop.xlane.xlu0 %1364 }
 0x44f   :  { %v1369_v18 = vmul.f32 0.0078125, %v1365_v24 }
 0x450   :  { %v1367_v25 = vpop.xlane.xlu1 %1366 }
 0x451   :  { %v1371_v11 = vsub.f32 %v1358_v16, %v1369_v18  ;;  %v1370_v7 = vmul.f32 0.0078125, %v1367_v25 }
 0x453   :  { %v1372_v12 = vsub.f32 %v1361_v20, %v1370_v7  ;;  %v1373_v58 = vmul.f32 %v1371_v11, %v1371_v11 }
 0x455   :  { %1375 = vadd.xlane.f32.xlu0 %v1373_v58  ;;  %v1374_v27 = vmul.f32 %v1372_v12, %v1372_v12 }
 0x457   :  { %1377 = vadd.xlane.f32.xlu1 %v1374_v27 }
 0x4e2   :  { %v1376_v4 = vpop.xlane.xlu0 %1375 }
 0x4e3   :  { %v1379_v31 = vmul.f32 0.0078125, %v1376_v4 }
 0x4e4   :  { %v1378_v57 = vpop.xlane.xlu1 %1377 }
 0x4e5   :  { %v1381_v34 = vadd.f32 1e-05, %v1379_v31  ;;  %v1380_v35 = vmul.f32 0.0078125, %v1378_v57 }
 0x4e7   :  { %1767 = vrsqrt.f32 %v1381_v34  ;;  %v1382_v62 = vadd.f32 1e-05, %v1380_v35 }
 0x4e9   :  { %1769 = vrsqrt.f32 %v1382_v62 }
 0x4f1   :  { %v1768_v22 = vpop.eup %1767 }
 0x4f2   :  { %v1385_v39 = vmul.f32 %v1768_v22, %v1371_v11 }
 0x4f3   :  { %v1770_v30 = vpop.eup %1769 }
 0x4f4   :  { %v1386_v8 = vmul.f32 %v1770_v30, %v1372_v12  ;;  %v1394_v21 = vmul.f32 %v1516_v26, %v1385_v39 }
 0x4f6   :  { %v1395_v37 = vmul.f32 %v1516_v26, %v1386_v8  ;;  %v1403_v54 = vadd.f32 %v1517_v41, %v1394_v21 }
 0x4f8   :  { %v1404_v59 = vadd.f32 %v1517_v41, %v1395_v37  ;;  %1405 = vst [vmem:[#allocation11] sm:$0xff] %v1403_v54 }
 0x4fa   :  { %1406 = vst [vmem:[#allocation11 + $0x8] sm:$0xff] %v1404_v59 }
 0x4fb   :  { %1892 = shalt.err (!%p1889_p2)
}
 0x4fc   :  { %s1893_s8 = scalar_lea.hbm %s2292_s9, 256 }
 0x4fd   :  { %p1894_p3 = scmp.ne.s32.totalorder %s2292_s9, %s1893_s8  ;;  %p1897_p4 = scmp.lt.u32.totalorder %s1893_s8, %s2292_s9 }
 0x4ff   :  { %p1899_p5 = pnand %p1897_p4, %p1894_p3 }
 0x501   :  { %1902 = shalt.err (!%p1899_p5)
}
 0x502   :  { %s1923_s15 = smov 128   ;;  %s1924_s19 = smov 8  }
 0x503   :  { %1418 = dma.vmem_to_hbm [thread:$0]  %s1413_s11, 256, %s2292_s9, [#allocation4], %s1923_s15, %s1923_s15, %s1924_s19  }
 0x504   :  { %1909 = dma.done.wait [#allocation4], 256  }
 0x505   :  { %1910 = vsyncadd [#allocation4], 4294967040 }
 0x506   :  { %1422 = vsyncpa [#allocation3], 1 }
 0x507   :  { %1423 = vsyncpa [#allocation6], 1 }
 0x508   :  { %1424 = vsyncpa [#allocation9], 1 }
 0x509   :  { %1425 = vsyncpa [#allocation4], 1 }

</bundles_post_ra>
